<compile_context>
chip_gen: v5e
topology: v5e:2x2
jax: 0.10.0
libtpu: 0.0.40
codegen_flags: <defaults>
</compile_context>

<pallas_src>
import jax
import jax.numpy as jnp
from jax.experimental import pallas as pl
from jax.experimental.pallas import tpu as pltpu


def _mse_sum_kernel(x_ref, t_ref, acc_ref):
    """Accumulate sum((t - x)^2) of the current tile into acc_ref (f32)."""
    @pl.when(pl.program_id(0) == 0)
    def _init():
        acc_ref[...] = jnp.zeros_like(acc_ref)

    d = t_ref[...].astype(jnp.float32) - x_ref[...].astype(jnp.float32)
    partial = jnp.sum(d * d).reshape(1, 1)
    acc_ref[...] = acc_ref[...] + partial


def mse_forward(x, targets, *, lane_width=512, max_tile_rows=1024,
                force_pallas=False):
    """MSE loss: mean((targets - x)^2) over all elements, returned as a scalar."""
    assert x.shape == targets.shape, "input and targets must have the same shape"

    out_dtype = x.dtype if jnp.issubdtype(x.dtype, jnp.floating) else jnp.float32
    total = int(x.size)

    # Small-input fast path: pallas_call launch overhead dominates below ~64K
    # elements; XLA's fused elementwise+reduce is strictly better there.
    if not force_pallas and total < (1 << 16):
        d = targets.astype(jnp.float32) - x.astype(jnp.float32)
        return jnp.mean(d * d).astype(out_dtype)

    itemsize = jnp.dtype(x.dtype).itemsize
    sublane = 8 if itemsize >= 4 else 16  # bf16/f16 pack 16 rows per vreg

    # Flatten to 1D, then view as (rows, lane_width) with lane_width a large
    # multiple of 128 -> full-width unmasked vector loads/stores.
    W = lane_width
    rows_needed = -(-total // W)
    tile_rows = min(max_tile_rows, -(-rows_needed // sublane) * sublane)
    rows_padded = -(-rows_needed // tile_rows) * tile_rows
    total_padded = rows_padded * W

    x1 = x.reshape(-1)
    t1 = targets.reshape(-1)
    pad = total_padded - total
    if pad:
        # Zero padding is exact for MSE: (0 - 0)^2 contributes nothing.
        x1 = jnp.pad(x1, (0, pad))
        t1 = jnp.pad(t1, (0, pad))
    x2 = x1.reshape(rows_padded, W)
    t2 = t1.reshape(rows_padded, W)

    grid = (rows_padded // tile_rows,)

    # VMEM budget: 2 inputs x 2 pipeline buffers x block bytes, plus headroom.
    block_bytes = tile_rows * W * itemsize
    vmem_limit = int(min(32 * 1024 * 1024,
                         max(8 * 1024 * 1024, 6 * block_bytes + 2 * 1024 * 1024)))

    sq_sum = pl.pallas_call(
        _mse_sum_kernel,
        out_shape=jax.ShapeDtypeStruct((1, 1), jnp.float32),
        grid_spec=pltpu.PrefetchScalarGridSpec(
            num_scalar_prefetch=0,
            grid=grid,
            in_specs=[
                pl.BlockSpec((tile_rows, W), lambda i: (i, 0)),
                pl.BlockSpec((tile_rows, W), lambda i: (i, 0)),
            ],
            # Accumulator: same output block for every grid step (stays
            # resident in VMEM across the reduction axis).
            out_specs=pl.BlockSpec((1, 1), lambda i: (0, 0)),
        ),
        compiler_params=pltpu.CompilerParams(
            dimension_semantics=("arbitrary",),
            vmem_limit_bytes=vmem_limit,
        ),
    )(x2, t2)

    return (sq_sum[0, 0] * (1.0 / float(total))).astype(out_dtype)


class LossMSE:
    """Mirror of the PyTorch `LossMSE` module (forward via the Pallas kernel)."""

    def __init__(self, targets, *, force_pallas=False):
        self.targets = targets
        self.N = targets.shape[0]
        self.last_input = None
        self.force_pallas = force_pallas

    def forward(self, input):
        # JAX arrays are immutable, so storing the reference matches `.clone()`.
        self.last_input = input
        return mse_forward(input, self.targets, force_pallas=self.force_pallas)

    def backward(self, gradwrtoutput=1.0):
        # Mirrors the reference backward (plain elementwise JAX; no kernel needed).
        return gradwrtoutput * (-2.0 / self.N) * (self.targets - self.last_input)

    def param(self):
        return []


if __name__ == "__main__":
    key = jax.random.PRNGKey(0)
    k1, k2, k3, k4 = jax.random.split(key, 4)

    # Small shape consistent with the framework's MLP usage: (batch, features).
    x = jax.random.normal(k1, (8, 32), dtype=jnp.float32)
    t = jax.random.normal(k2, (8, 32), dtype=jnp.float32)

    loss_mod = LossMSE(t, force_pallas=True)   # force the Pallas path for the demo
    loss = loss_mod.forward(x)
    loss = jax.block_until_ready(loss)

    ref = jnp.mean(jnp.mean((t - x) ** 2, axis=1))
    assert loss.shape == () and loss.dtype == x.dtype
    assert jnp.allclose(loss, ref, atol=1e-6, rtol=1e-6)

    # Second check: ragged size + small tile forces padding and a multi-step
    # reduction grid (exercises the accumulator init/accumulate path).
    x2 = jax.random.normal(k3, (64, 300), dtype=jnp.float32)
    t2 = jax.random.normal(k4, (64, 300), dtype=jnp.float32)
    loss2 = mse_forward(x2, t2, max_tile_rows=8, force_pallas=True)
    loss2 = jax.block_until_ready(loss2)
    ref2 = jnp.mean(jnp.mean((t2 - x2) ** 2, axis=1))
    assert jnp.allclose(loss2, ref2, atol=1e-6, rtol=1e-6)

    print("KERNEL_OK")
</pallas_src>

<mosaic_0001>
module attributes {stable_mosaic.version = 11 : i64} {
  func.func @_mse_sum_kernel(%arg0: i32, %arg1: memref<8x512xf32, #tpu.memory_space<vmem>>, %arg2: memref<8x512xf32, #tpu.memory_space<vmem>>, %arg3: memref<1x1xf32, #tpu.memory_space<vmem>>) attributes {dimension_semantics = [#tpu.dimension_semantics<arbitrary>], iteration_bounds = array<i64: 1>, scalar_prefetch = 0 : i64, scratch_operands = 0 : i64, tpu.core_type = #tpu.core_type<tc>, window_params = [{transform_indices = @transform_0, window_bounds = array<i64: 8, 512>}, {transform_indices = @transform_1, window_bounds = array<i64: 8, 512>}, {pipeline_mode = #tpu.pipeline_mode<synchronous>, transform_indices = @transform_2, window_bounds = array<i64: 1, 1>}]} {
    %c0_i32 = arith.constant 0 : i32
    %0 = arith.cmpi eq, %arg0, %c0_i32 : i32
    %1 = arith.extui %0 : i1 to i32
    %c0_i32_0 = arith.constant 0 : i32
    %2 = arith.cmpi ne, %1, %c0_i32_0 : i32
    scf.if %2 {
      %cst_8 = arith.constant 0.000000e+00 : f32
      %15 = vector.broadcast %cst_8 : f32 to vector<1x1xf32>
      %c0_9 = arith.constant 0 : index
      %c0_10 = arith.constant 0 : index
      %16 = vector.load %arg3[%c0_9, %c0_10] : memref<1x1xf32, #tpu.memory_space<vmem>>, vector<1x1xf32>
      tpu.vector_store %arg3[%c0_9, %c0_10], %15 {strides = array<i32>} : memref<1x1xf32, #tpu.memory_space<vmem>>, vector<1x1xf32>,
    } else {
    }
    %c0 = arith.constant 0 : index
    %c0_1 = arith.constant 0 : index
    %3 = vector.load %arg2[%c0, %c0_1] : memref<8x512xf32, #tpu.memory_space<vmem>>, vector<8x512xf32>
    %c0_2 = arith.constant 0 : index
    %c0_3 = arith.constant 0 : index
    %4 = vector.load %arg1[%c0_2, %c0_3] : memref<8x512xf32, #tpu.memory_space<vmem>>, vector<8x512xf32>
    %5 = arith.subf %3, %4 : vector<8x512xf32>
    %6 = arith.mulf %5, %5 : vector<8x512xf32>
    %7 = vector.shape_cast %6 : vector<8x512xf32> to vector<1x8x512xf32>
    %cst = arith.constant dense<0.000000e+00> : vector<1xf32>
    %8 = vector.multi_reduction <add>, %7, %cst [1, 2] : vector<1x8x512xf32> to vector<1xf32>
    %9 = vector.shape_cast %8 : vector<1xf32> to vector<1x1x1xf32>
    %10 = vector.extract %9[0, 0, 0] : f32 from vector<1x1x1xf32>
    %11 = vector.broadcast %10 : f32 to vector<1x1xf32>
    %c0_4 = arith.constant 0 : index
    %c0_5 = arith.constant 0 : index
    %12 = vector.load %arg3[%c0_4, %c0_5] : memref<1x1xf32, #tpu.memory_space<vmem>>, vector<1x1xf32>
    %13 = arith.addf %12, %11 : vector<1x1xf32>
    %c0_6 = arith.constant 0 : index
    %c0_7 = arith.constant 0 : index
    %14 = vector.load %arg3[%c0_6, %c0_7] : memref<1x1xf32, #tpu.memory_space<vmem>>, vector<1x1xf32>
    tpu.vector_store %arg3[%c0_6, %c0_7], %13 {strides = array<i32>} : memref<1x1xf32, #tpu.memory_space<vmem>>, vector<1x1xf32>,
    return
  }
  func.func @transform_0(%arg0: i32) -> (i32, i32) {
    %c0_i32 = arith.constant 0 : i32
    %c0_i32_0 = arith.constant 0 : i32
    return %arg0, %c0_i32 : i32, i32
  }
  func.func @transform_1(%arg0: i32) -> (i32, i32) {
    %c0_i32 = arith.constant 0 : i32
    %c0_i32_0 = arith.constant 0 : i32
    return %arg0, %c0_i32 : i32, i32
  }
  func.func @transform_2(%arg0: i32) -> (i32, i32) {
    %c0_i32 = arith.constant 0 : i32
    %c0_i32_0 = arith.constant 0 : i32
    %c0_i32_1 = arith.constant 0 : i32
    return %c0_i32, %c0_i32_0 : i32, i32
  }
}

</mosaic_0001>

<bundles_post_ra>
// kernel: tpu_custom_call.1
= control target key start
LH: loop header
LB: loop body
LE: loop exit
PB: predicated region body
PF: predicated region fallthrough
CT: control target
= control target key end

     0   :  { %7 = vsyncpa [#allocation3], 0  ;;  %s211_s0 = inlined_call_operand.hbm [shape: f32[8,512], index: 0, kind: input, shape index: {}]   ;;  %s212_s1 = inlined_call_operand.hbm [shape: f32[8,512], index: 1, kind: input, shape index: {}]   ;;  %s213_s2 = inlined_call_operand.hbm [shape: f32[1,1], index: 2, kind: output, shape index: {}]  }
   0x1   :  { %8 = vsyncpa [#allocation6], 0 }
   0x2   :  { %9 = vsyncpa [#allocation4], 0  ;;  %s15_s11 = sshll.u32 %s211_s0, 4  ;;  %s181_s12 = smov [#allocation2]   ;;  %s16_s11 = int_to_ptr.hbm [resolvable:$true] %s15_s11 }
   0x3   :  { %s17_s13 = sshll.u32 %s181_s12, 4  ;;  %s26_s16 = sshll.u32 %s212_s1, 4  ;;  %s18_s13 = int_to_ptr.vmem [resolvable:$true] %s17_s13  ;;  %s27_s16 = int_to_ptr.hbm [resolvable:$true] %s26_s16 }
   0x4   :  { %20 = dma.hbm_to_vmem [thread:$0]  %s16_s11, 512, %s18_s13, [#allocation3]  }
   0x5   :  { %s182_s17 = smov [#allocation5]  }
   0x6   :  { %s28_s18 = sshll.u32 %s182_s17, 4  ;;  %s29_s18 = int_to_ptr.vmem [resolvable:$true] %s28_s18 }
   0x7   :  { %31 = dma.hbm_to_vmem [thread:$0]  %s27_s16, 512, %s29_s18, [#allocation6]  }
   0x8   :  { %175 = dma.done.wait [#allocation3], 512  }
   0x9   :  { %176 = vsyncadd [#allocation3], 4294966784 }
   0xa   :  { %177 = dma.done.wait [#allocation6], 512  }
   0xb   :  { %178 = vsyncadd [#allocation6], 4294966784  ;;  %v46_v0 = vld [vmem:[#allocation5] sm:$0xff]  ;;  %v47_v1 = vld [vmem:[#allocation5 + $0x8] sm:$0xff]  ;;  %vm44_vm0 = vcmask 0   ;;  %v183_v19 = vmov 0.0  }
   0xc   :  { %v48_v2 = vld [vmem:[#allocation5 + $0x10] sm:$0xff]  ;;  %v49_v3 = vld [vmem:[#allocation5 + $0x18] sm:$0xff]  ;;  %v50_v4 = vld [vmem:[#allocation2] sm:$0xff]  ;;  %45 = vst.msk [vmem:[#allocation7] sm:$0x1] %vm44_vm0, %v183_v19  ;;  %s184_s0 = smov [#allocation7]  }
   0xd   :  { %v51_v5 = vld [vmem:[#allocation2 + $0x8] sm:$0xff]  ;;  %v52_v6 = vld [vmem:[#allocation2 + $0x10] sm:$0xff]  ;;  %v53_v7 = vld [vmem:[#allocation2 + $0x18] sm:$0xff]  ;;  %v54_v8 = vsub.f32 %v46_v0, %v50_v4  ;;  %s84_s1 = sshll.u32 %s184_s0, 4  ;;  %s86_s21 = sshll.u32 %s213_s2, 4  ;;  %s85_s1 = int_to_ptr.vmem [resolvable:$true] %s84_s1  ;;  %s87_s21 = int_to_ptr.hbm [resolvable:$true] %s86_s21 }
   0xe   :  { %v55_v9 = vsub.f32 %v47_v1, %v51_v5  ;;  %v56_v10 = vsub.f32 %v48_v2, %v52_v6  ;;  %v57_v11 = vsub.f32 %v49_v3, %v53_v7 }
   0xf   :  { %v58_v12 = vmul.f32 %v54_v8, %v54_v8 }
  0x10   :  { %v59_v13 = vmul.f32 %v55_v9, %v55_v9  ;;  %v60_v14 = vmul.f32 %v56_v10, %v56_v10  ;;  %v61_v15 = vmul.f32 %v57_v11, %v57_v11 }
  0x12   :  { %v62_v16 = vadd.f32 %v59_v13, %v58_v12 }
  0x13   :  { %v75_v27 = vld [vmem:[#allocation7] sm:$0x1] }
  0x14   :  { %v63_v17 = vadd.f32 %v62_v16, %v60_v14 }
  0x16   :  { %v64_v18 = vadd.f32 %v63_v17, %v61_v15 }
  0x18   :  { %65 = vadd.xlane.f32.xlu0 %v64_v18 }
  0x8b   :  { %v66_v20 = vpop.xlane.xlu0 %65 }
  0x8c   :  { %v67_v21 = vrot.slane %v66_v20, 4 }
  0x8e   :  { %v68_v22 = vadd.f32 %v67_v21, %v66_v20 }
  0x90   :  { %v69_v23 = vrot.slane %v68_v22, 2 }
  0x92   :  { %v70_v24 = vadd.f32 %v69_v23, %v68_v22 }
  0x94   :  { %v71_v25 = vrot.slane %v70_v24, 1 }
  0x96   :  { %v72_v26 = vadd.f32 %v71_v25, %v70_v24 }
  0x98   :  { %97 = vpush %v72_v26 }
  0xc9   :  { %s98_s22 = spop %97 }
  0xca   :  { %v74_v28 = vstv %s98_s22 }
  0xcb   :  { %v76_v29 = vadd.f32 %v75_v27, %v74_v28 }
  0xcd   :  { %78 = vst.msk [vmem:[#allocation7] sm:$0x1] %vm44_vm0, %v76_v29 }
  0xce   :  { %89 = dma.vmem_to_hbm [thread:$0]  %s85_s1, 16, %s87_s21, [#allocation4]  }
  0xcf   :  { %179 = dma.done.wait [#allocation4], 16  }
  0xd0   :  { %180 = vsyncadd [#allocation4], 4294967280 }
  0xd1   :  { %94 = vsyncpa [#allocation3], 1 }
  0xd2   :  { %95 = vsyncpa [#allocation6], 1 }
  0xd3   :  { %96 = vsyncpa [#allocation4], 1 }

</bundles_post_ra>
